<compile_context>
chip_gen: v5e
topology: v5e:2x2
jax: 0.10.0
libtpu: 0.0.40
codegen_flags: <defaults>
</compile_context>

<pallas_src>
import jax
import jax.numpy as jnp
import numpy as np
from jax.experimental import pallas as pl
from jax.experimental.pallas import tpu as pltpu


# --------------------------------------------------------------------------- #
# Kernel
# --------------------------------------------------------------------------- #
def _lineconv_kernel(prop_ref, wT_ref, hidden_ref, out_ref, acc_ref):
    li = pl.program_id(1)                      # position along the L (reduction) axis
    n_b = hidden_ref.shape[0]                  # static batch size

    @pl.when(li == 0)
    def _init():
        acc_ref[...] = jnp.zeros_like(acc_ref)

    # Weighted (masked) partial sum over this L tile.
    # wT block is (tl, B): tl lives on sublanes (same as hidden's tl), so the
    # per-session column wT[:, b:b+1] is already a (tl, 1) lane-broadcastable
    # factor -- a plain multiply + sublane reduce, no mask reconstruction.
    for b in range(n_b):                       # static unroll over sessions
        h_b = hidden_ref[b].astype(jnp.float32)          # (tl, th) f32
        w_b = wT_ref[:, b:b + 1]                         # (tl, 1)  f32
        acc_ref[b:b + 1, :] += jnp.sum(h_b * w_b, axis=0, keepdims=True)

    @pl.when(li == pl.num_programs(1) - 1)
    def _finalize():
        # prop already folds (I + DA + ... + DA^steps), the per-session 1/count
        # and the global 1/(steps+1): out = prop @ masked_sum (one small matmul).
        out_ref[...] = jnp.dot(
            prop_ref[...], acc_ref[...],
            preferred_element_type=jnp.float32,
        ).astype(out_ref.dtype)


# --------------------------------------------------------------------------- #
# Tiling / VMEM helpers
# --------------------------------------------------------------------------- #
def _cdiv(a, b):
    return -(-a // b)


def _round_up(a, m):
    return _cdiv(a, m) * m


def _tpu_params():
    """Generation-aware block budget / VMEM cap / megacore split."""
    kind = ""
    try:
        kind = jax.devices()[0].device_kind.lower()
    except Exception:
        pass
    if "v7" in kind or "7x" in kind:
        # 64 MiB VMEM per TensorCore, 2 TensorCores per chip.
        return {"block_budget": 8 << 20, "vmem_cap": 48 << 20, "two_h_tiles": True}
    if any(t in kind for t in ("v6", "v5", "v4")):
        # 128 MiB physical VMEM, single TensorCore grid.
        return {"block_budget": 16 << 20, "vmem_cap": 96 << 20, "two_h_tiles": False}
    # Unknown generation: assume the tighter (v7x-like) limits.
    return {"block_budget": 8 << 20, "vmem_cap": 48 << 20, "two_h_tiles": True}


def _choose_tiles(B, L, H, itemsize, params):
    """Returns (tl, th, L_pad)."""
    budget = params["block_budget"]
    l_align = max(8, 32 // itemsize)           # 8 f32, 16 bf16, 32 int8/fp8

    # --- feature (H) tile: prefer the full feature dim (long contiguous DMA
    # rows); split in two on v7x so both TensorCores get parallel work. ------
    th = H
    if params["two_h_tiles"] and H % 256 == 0:
        th = H // 2
    # Only shrink th further if even a minimal L slab would blow the budget.
    if B * l_align * th * itemsize > budget and H % 128 == 0:
        cand = budget // max(1, B * l_align * itemsize)
        cand = max(128, (cand // 128) * 128)
        while cand > 128 and H % cand != 0:
            cand -= 128
        if H % cand == 0:
            th = cand

    # --- sequence (L) tile: as large as the block budget allows -------------
    max_tl = budget // max(1, B * th * itemsize)
    if L <= max_tl:
        return L, th, L                        # whole L resident in one block
    max_tl = max(l_align, (max_tl // l_align) * l_align)
    t = max_tl                                 # largest aligned divisor -> no padding
    while t >= l_align:
        if L % t == 0:
            return t, th, L
        t -= l_align
    # No aligned divisor: spread L over the minimal number of tiles and pad.
    n = _cdiv(L, max_tl)
    tl = _round_up(_cdiv(L, n), l_align)
    return tl, th, n * tl


def _vmem_limit_bytes(B, tl, th, itemsize, params):
    def padded(r, c, isz):                     # (8, 128)-padded 2-D tile bytes
        return _round_up(r, 8) * _round_up(c, 128) * isz

    hidden_blk = B * padded(tl, th, itemsize)
    w_blk = padded(tl, B, 4)
    prop = padded(B, B, 4)
    io = padded(B, th, 4)
    est = 2 * hidden_blk + 2 * w_blk + 2 * prop + 3 * io   # dbl-buffered in/out + acc
    est = int(est * 1.25) + (4 << 20)                      # headroom + compiler scratch
    return int(max(32 << 20, min(params["vmem_cap"], est)))


# --------------------------------------------------------------------------- #
# Wrapper
# --------------------------------------------------------------------------- #
def line_conv(hidden, DA, mask=None, *, steps: int = 1, tile_l=None, tile_h=None):
    """Pallas implementation of LineConv.forward.

    hidden: (B, L, H) float32 or bfloat16 (streamed in its own dtype)
    DA:     (B, B)
    mask:   (B, L) bool/0-1 mask (arbitrary masks supported), optional
    """
    B, L, H = hidden.shape
    itemsize = jnp.dtype(hidden.dtype).itemsize

    # --- 0/1 session weights (transposed (L, B)) and valid counts -----------
    if mask is None:
        w = jnp.ones((B, L), jnp.float32)
        counts = jnp.full((B,), float(L), jnp.float32)
    else:
        w = mask.astype(jnp.float32)
        counts = jnp.sum(w, axis=1)
    wT = w.T                                   # (L, B)

    # --- hoisted propagation operator (computed once, in the wrapper) -------
    # prop = (I + DA + ... + DA^steps) * diag(1 / (count * (steps + 1)))
    # A zero count gives inf/nan, matching the reference's division by zero.
    da = DA.astype(jnp.float32)
    term = jnp.eye(B, dtype=jnp.float32)
    psum = jnp.eye(B, dtype=jnp.float32)
    for _ in range(steps):
        term = da @ term
        psum = psum + term
    prop = psum * (1.0 / (counts * float(steps + 1)))[None, :]

    # --- tiling --------------------------------------------------------------
    params = _tpu_params()
    tl, th, L_pad = _choose_tiles(B, L, H, itemsize, params)
    if tile_h is not None:
        assert H % tile_h == 0 and (tile_h % 128 == 0 or tile_h == H)
        th = tile_h
    if tile_l is not None:
        assert tile_l % 8 == 0 or tile_l == L
        tl = tile_l
        L_pad = _round_up(L, tl)

    if L_pad != L:                             # pad so the L grid divides evenly;
        hidden = jnp.pad(hidden, ((0, 0), (0, L_pad - L), (0, 0)))
        wT = jnp.pad(wT, ((0, L_pad - L), (0, 0)))   # padded weights are 0 -> no effect

    grid = (H // th, L_pad // tl)
    vmem_limit = _vmem_limit_bytes(B, tl, th, itemsize, params)

    return pl.pallas_call(
        _lineconv_kernel,
        out_shape=jax.ShapeDtypeStruct((B, H), jnp.float32),
        grid_spec=pltpu.PrefetchScalarGridSpec(
            num_scalar_prefetch=0,
            grid=grid,
            in_specs=[
                pl.BlockSpec((B, B), lambda hi, li: (0, 0)),            # prop (resident)
                pl.BlockSpec((tl, B), lambda hi, li: (li, 0)),          # weights (tiny stream)
                pl.BlockSpec((B, tl, th), lambda hi, li: (0, li, hi)),  # hidden stream
            ],
            out_specs=pl.BlockSpec((B, th), lambda hi, li: (0, hi)),
            scratch_shapes=[pltpu.VMEM((B, th), jnp.float32)],
        ),
        compiler_params=pltpu.CompilerParams(
            dimension_semantics=("parallel", "arbitrary"),
            vmem_limit_bytes=vmem_limit,
        ),
    )(prop, wT, hidden)


# --------------------------------------------------------------------------- #
# Reference + self-test
# --------------------------------------------------------------------------- #
def _reference(hidden, DA, mask, steps):
    hidden = np.asarray(hidden, np.float32)
    DA = np.asarray(DA, np.float32)
    mask = np.asarray(mask, np.float32)
    s = (hidden * mask[:, :, None]).sum(1) / mask.sum(1, keepdims=True)
    acc = s.copy()
    for _ in range(steps):
        s = DA @ s
        acc += s
    return acc / (steps + 1)


if __name__ == "__main__":
    B, L, H = 8, 72, 256
    steps = 2

    key = jax.random.PRNGKey(0)
    k_h, k_da = jax.random.split(key)

    hidden = jax.random.normal(k_h, (B, L, H), dtype=jnp.float32)
    DA = jax.random.uniform(k_da, (B, B), dtype=jnp.float32) / B

    # deterministic variable-length prefix mask (any 0/1 mask is supported)
    lengths = 1 + (jnp.arange(B) * 11) % L
    mask = jnp.arange(L)[None, :] < lengths[:, None]          # (B, L) bool

    ref = _reference(hidden, DA, mask, steps)

    # 1) f32 hidden, auto-picked tiles (full-H tile, whole L resident)
    out = jax.block_until_ready(line_conv(hidden, DA, mask, steps=steps))
    np.testing.assert_allclose(np.asarray(out), ref, rtol=1e-5, atol=1e-5)

    # 2) forced small tiles: multi-step L reduction, 2 H tiles, L padding (72 -> 80)
    out_t = jax.block_until_ready(
        line_conv(hidden, DA, mask, steps=steps, tile_l=16, tile_h=128))
    np.testing.assert_allclose(np.asarray(out_t), ref, rtol=1e-5, atol=1e-5)

    # 3) mask=None (plain mean over L)
    out_nm = jax.block_until_ready(line_conv(hidden, DA, None, steps=1))
    ref_nm = _reference(hidden, DA, np.ones((B, L), np.float32), 1)
    np.testing.assert_allclose(np.asarray(out_nm), ref_nm, rtol=1e-5, atol=1e-5)

    # 4) bf16 hidden: half the HBM bytes streamed; accumulation stays f32
    hidden_bf16 = hidden.astype(jnp.bfloat16)
    out_bf = jax.block_until_ready(line_conv(hidden_bf16, DA, mask, steps=steps))
    ref_bf = _reference(np.asarray(hidden_bf16.astype(jnp.float32)), DA, mask, steps)
    np.testing.assert_allclose(np.asarray(out_bf), ref_bf, rtol=1e-4, atol=1e-4)

    print("KERNEL_OK")
</pallas_src>

<mosaic_0001>
module attributes {stable_mosaic.version = 11 : i64} {
  func.func @_lineconv_kernel(%arg0: i32, %arg1: i32, %arg2: memref<8x8xf32, #tpu.memory_space<vmem>>, %arg3: memref<72x8xf32, #tpu.memory_space<vmem>>, %arg4: memref<8x72x128xf32, #tpu.memory_space<vmem>>, %arg5: memref<8x128xf32, #tpu.memory_space<vmem>>, %arg6: memref<8x128xf32, #tpu.memory_space<vmem>>) attributes {dimension_semantics = [#tpu.dimension_semantics<parallel>, #tpu.dimension_semantics<arbitrary>], iteration_bounds = array<i64: 2, 1>, scalar_prefetch = 0 : i64, scratch_operands = 1 : i64, tpu.core_type = #tpu.core_type<tc>, window_params = [{pipeline_mode = #tpu.pipeline_mode<synchronous>, transform_indices = @transform_0, window_bounds = array<i64: 8, 8>}, {transform_indices = @transform_1, window_bounds = array<i64: 72, 8>}, {transform_indices = @transform_2, window_bounds = array<i64: 8, 72, 128>}, {transform_indices = @transform_3, window_bounds = array<i64: 8, 128>}]} {
    %c0_i32 = arith.constant 0 : i32
    %0 = arith.cmpi eq, %arg1, %c0_i32 : i32
    %1 = arith.extui %0 : i1 to i32
    %c0_i32_0 = arith.constant 0 : i32
    %2 = arith.cmpi ne, %1, %c0_i32_0 : i32
    scf.if %2 {
      %cst_74 = arith.constant 0.000000e+00 : f32
      %86 = vector.broadcast %cst_74 : f32 to vector<8x128xf32>
      %c0_75 = arith.constant 0 : index
      %c0_76 = arith.constant 0 : index
      %87 = vector.load %arg6[%c0_75, %c0_76] : memref<8x128xf32, #tpu.memory_space<vmem>>, vector<8x128xf32>
      tpu.vector_store %arg6[%c0_75, %c0_76], %86 {strides = array<i32>} : memref<8x128xf32, #tpu.memory_space<vmem>>, vector<8x128xf32>,
    } else {
    }
    %c0 = arith.constant 0 : index
    %c0_1 = arith.constant 0 : index
    %c0_2 = arith.constant 0 : index
    %3 = vector.load %arg4[%c0, %c0_1, %c0_2] : memref<8x72x128xf32, #tpu.memory_space<vmem>>, vector<1x72x128xf32>
    %4 = vector.shape_cast %3 : vector<1x72x128xf32> to vector<72x128xf32>
    %c0_3 = arith.constant 0 : index
    %c0_4 = arith.constant 0 : index
    %5 = vector.load %arg3[%c0_3, %c0_4] : memref<72x8xf32, #tpu.memory_space<vmem>>, vector<72x1xf32>
    %c0_5 = arith.constant 0 : index
    %c0_6 = arith.constant 0 : index
    %6 = vector.load %arg6[%c0_5, %c0_6] : memref<8x128xf32, #tpu.memory_space<vmem>>, vector<1x128xf32>
    %7 = vector.broadcast %5 : vector<72x1xf32> to vector<72x128xf32>
    %8 = arith.mulf %4, %7 : vector<72x128xf32>
    %cst = arith.constant dense<0.000000e+00> : vector<128xf32>
    %9 = vector.multi_reduction <add>, %8, %cst [0] : vector<72x128xf32> to vector<128xf32>
    %10 = vector.shape_cast %9 : vector<128xf32> to vector<1x128xf32>
    %11 = arith.addf %6, %10 : vector<1x128xf32>
    %c0_7 = arith.constant 0 : index
    %c0_8 = arith.constant 0 : index
    %12 = vector.load %arg6[%c0_7, %c0_8] : memref<8x128xf32, #tpu.memory_space<vmem>>, vector<1x128xf32>
    tpu.vector_store %arg6[%c0_7, %c0_8], %11 {strides = array<i32>} : memref<8x128xf32, #tpu.memory_space<vmem>>, vector<1x128xf32>,
    %c1 = arith.constant 1 : index
    %c0_9 = arith.constant 0 : index
    %c0_10 = arith.constant 0 : index
    %13 = vector.load %arg4[%c1, %c0_9, %c0_10] : memref<8x72x128xf32, #tpu.memory_space<vmem>>, vector<1x72x128xf32>
    %14 = vector.shape_cast %13 : vector<1x72x128xf32> to vector<72x128xf32>
    %c0_11 = arith.constant 0 : index
    %c1_12 = arith.constant 1 : index
    %15 = vector.load %arg3[%c0_11, %c1_12] : memref<72x8xf32, #tpu.memory_space<vmem>>, vector<72x1xf32>
    %c1_13 = arith.constant 1 : index
    %c0_14 = arith.constant 0 : index
    %16 = vector.load %arg6[%c1_13, %c0_14] : memref<8x128xf32, #tpu.memory_space<vmem>>, vector<1x128xf32>
    %17 = vector.broadcast %15 : vector<72x1xf32> to vector<72x128xf32>
    %18 = arith.mulf %14, %17 : vector<72x128xf32>
    %cst_15 = arith.constant dense<0.000000e+00> : vector<128xf32>
    %19 = vector.multi_reduction <add>, %18, %cst_15 [0] : vector<72x128xf32> to vector<128xf32>
    %20 = vector.shape_cast %19 : vector<128xf32> to vector<1x128xf32>
    %21 = arith.addf %16, %20 : vector<1x128xf32>
    %c1_16 = arith.constant 1 : index
    %c0_17 = arith.constant 0 : index
    %22 = vector.load %arg6[%c1_16, %c0_17] : memref<8x128xf32, #tpu.memory_space<vmem>>, vector<1x128xf32>
    tpu.vector_store %arg6[%c1_16, %c0_17], %21 {strides = array<i32>} : memref<8x128xf32, #tpu.memory_space<vmem>>, vector<1x128xf32>,
    %c2 = arith.constant 2 : index
    %c0_18 = arith.constant 0 : index
    %c0_19 = arith.constant 0 : index
    %23 = vector.load %arg4[%c2, %c0_18, %c0_19] : memref<8x72x128xf32, #tpu.memory_space<vmem>>, vector<1x72x128xf32>
    %24 = vector.shape_cast %23 : vector<1x72x128xf32> to vector<72x128xf32>
    %c0_20 = arith.constant 0 : index
    %c2_21 = arith.constant 2 : index
    %25 = vector.load %arg3[%c0_20, %c2_21] : memref<72x8xf32, #tpu.memory_space<vmem>>, vector<72x1xf32>
    %c2_22 = arith.constant 2 : index
    %c0_23 = arith.constant 0 : index
    %26 = vector.load %arg6[%c2_22, %c0_23] : memref<8x128xf32, #tpu.memory_space<vmem>>, vector<1x128xf32>
    %27 = vector.broadcast %25 : vector<72x1xf32> to vector<72x128xf32>
    %28 = arith.mulf %24, %27 : vector<72x128xf32>
    %cst_24 = arith.constant dense<0.000000e+00> : vector<128xf32>
    %29 = vector.multi_reduction <add>, %28, %cst_24 [0] : vector<72x128xf32> to vector<128xf32>
    %30 = vector.shape_cast %29 : vector<128xf32> to vector<1x128xf32>
    %31 = arith.addf %26, %30 : vector<1x128xf32>
    %c2_25 = arith.constant 2 : index
    %c0_26 = arith.constant 0 : index
    %32 = vector.load %arg6[%c2_25, %c0_26] : memref<8x128xf32, #tpu.memory_space<vmem>>, vector<1x128xf32>
    tpu.vector_store %arg6[%c2_25, %c0_26], %31 {strides = array<i32>} : memref<8x128xf32, #tpu.memory_space<vmem>>, vector<1x128xf32>,
    %c3 = arith.constant 3 : index
    %c0_27 = arith.constant 0 : index
    %c0_28 = arith.constant 0 : index
    %33 = vector.load %arg4[%c3, %c0_27, %c0_28] : memref<8x72x128xf32, #tpu.memory_space<vmem>>, vector<1x72x128xf32>
    %34 = vector.shape_cast %33 : vector<1x72x128xf32> to vector<72x128xf32>
    %c0_29 = arith.constant 0 : index
    %c3_30 = arith.constant 3 : index
    %35 = vector.load %arg3[%c0_29, %c3_30] : memref<72x8xf32, #tpu.memory_space<vmem>>, vector<72x1xf32>
    %c3_31 = arith.constant 3 : index
    %c0_32 = arith.constant 0 : index
    %36 = vector.load %arg6[%c3_31, %c0_32] : memref<8x128xf32, #tpu.memory_space<vmem>>, vector<1x128xf32>
    %37 = vector.broadcast %35 : vector<72x1xf32> to vector<72x128xf32>
    %38 = arith.mulf %34, %37 : vector<72x128xf32>
    %cst_33 = arith.constant dense<0.000000e+00> : vector<128xf32>
    %39 = vector.multi_reduction <add>, %38, %cst_33 [0] : vector<72x128xf32> to vector<128xf32>
    %40 = vector.shape_cast %39 : vector<128xf32> to vector<1x128xf32>
    %41 = arith.addf %36, %40 : vector<1x128xf32>
    %c3_34 = arith.constant 3 : index
    %c0_35 = arith.constant 0 : index
    %42 = vector.load %arg6[%c3_34, %c0_35] : memref<8x128xf32, #tpu.memory_space<vmem>>, vector<1x128xf32>
    tpu.vector_store %arg6[%c3_34, %c0_35], %41 {strides = array<i32>} : memref<8x128xf32, #tpu.memory_space<vmem>>, vector<1x128xf32>,
    %c4 = arith.constant 4 : index
    %c0_36 = arith.constant 0 : index
    %c0_37 = arith.constant 0 : index
    %43 = vector.load %arg4[%c4, %c0_36, %c0_37] : memref<8x72x128xf32, #tpu.memory_space<vmem>>, vector<1x72x128xf32>
    %44 = vector.shape_cast %43 : vector<1x72x128xf32> to vector<72x128xf32>
    %c0_38 = arith.constant 0 : index
    %c4_39 = arith.constant 4 : index
    %45 = vector.load %arg3[%c0_38, %c4_39] : memref<72x8xf32, #tpu.memory_space<vmem>>, vector<72x1xf32>
    %c4_40 = arith.constant 4 : index
    %c0_41 = arith.constant 0 : index
    %46 = vector.load %arg6[%c4_40, %c0_41] : memref<8x128xf32, #tpu.memory_space<vmem>>, vector<1x128xf32>
    %47 = vector.broadcast %45 : vector<72x1xf32> to vector<72x128xf32>
    %48 = arith.mulf %44, %47 : vector<72x128xf32>
    %cst_42 = arith.constant dense<0.000000e+00> : vector<128xf32>
    %49 = vector.multi_reduction <add>, %48, %cst_42 [0] : vector<72x128xf32> to vector<128xf32>
    %50 = vector.shape_cast %49 : vector<128xf32> to vector<1x128xf32>
    %51 = arith.addf %46, %50 : vector<1x128xf32>
    %c4_43 = arith.constant 4 : index
    %c0_44 = arith.constant 0 : index
    %52 = vector.load %arg6[%c4_43, %c0_44] : memref<8x128xf32, #tpu.memory_space<vmem>>, vector<1x128xf32>
    tpu.vector_store %arg6[%c4_43, %c0_44], %51 {strides = array<i32>} : memref<8x128xf32, #tpu.memory_space<vmem>>, vector<1x128xf32>,
    %c5 = arith.constant 5 : index
    %c0_45 = arith.constant 0 : index
    %c0_46 = arith.constant 0 : index
    %53 = vector.load %arg4[%c5, %c0_45, %c0_46] : memref<8x72x128xf32, #tpu.memory_space<vmem>>, vector<1x72x128xf32>
    %54 = vector.shape_cast %53 : vector<1x72x128xf32> to vector<72x128xf32>
    %c0_47 = arith.constant 0 : index
    %c5_48 = arith.constant 5 : index
    %55 = vector.load %arg3[%c0_47, %c5_48] : memref<72x8xf32, #tpu.memory_space<vmem>>, vector<72x1xf32>
    %c5_49 = arith.constant 5 : index
    %c0_50 = arith.constant 0 : index
    %56 = vector.load %arg6[%c5_49, %c0_50] : memref<8x128xf32, #tpu.memory_space<vmem>>, vector<1x128xf32>
    %57 = vector.broadcast %55 : vector<72x1xf32> to vector<72x128xf32>
    %58 = arith.mulf %54, %57 : vector<72x128xf32>
    %cst_51 = arith.constant dense<0.000000e+00> : vector<128xf32>
    %59 = vector.multi_reduction <add>, %58, %cst_51 [0] : vector<72x128xf32> to vector<128xf32>
    %60 = vector.shape_cast %59 : vector<128xf32> to vector<1x128xf32>
    %61 = arith.addf %56, %60 : vector<1x128xf32>
    %c5_52 = arith.constant 5 : index
    %c0_53 = arith.constant 0 : index
    %62 = vector.load %arg6[%c5_52, %c0_53] : memref<8x128xf32, #tpu.memory_space<vmem>>, vector<1x128xf32>
    tpu.vector_store %arg6[%c5_52, %c0_53], %61 {strides = array<i32>} : memref<8x128xf32, #tpu.memory_space<vmem>>, vector<1x128xf32>,
    %c6 = arith.constant 6 : index
    %c0_54 = arith.constant 0 : index
    %c0_55 = arith.constant 0 : index
    %63 = vector.load %arg4[%c6, %c0_54, %c0_55] : memref<8x72x128xf32, #tpu.memory_space<vmem>>, vector<1x72x128xf32>
    %64 = vector.shape_cast %63 : vector<1x72x128xf32> to vector<72x128xf32>
    %c0_56 = arith.constant 0 : index
    %c6_57 = arith.constant 6 : index
    %65 = vector.load %arg3[%c0_56, %c6_57] : memref<72x8xf32, #tpu.memory_space<vmem>>, vector<72x1xf32>
    %c6_58 = arith.constant 6 : index
    %c0_59 = arith.constant 0 : index
    %66 = vector.load %arg6[%c6_58, %c0_59] : memref<8x128xf32, #tpu.memory_space<vmem>>, vector<1x128xf32>
    %67 = vector.broadcast %65 : vector<72x1xf32> to vector<72x128xf32>
    %68 = arith.mulf %64, %67 : vector<72x128xf32>
    %cst_60 = arith.constant dense<0.000000e+00> : vector<128xf32>
    %69 = vector.multi_reduction <add>, %68, %cst_60 [0] : vector<72x128xf32> to vector<128xf32>
    %70 = vector.shape_cast %69 : vector<128xf32> to vector<1x128xf32>
    %71 = arith.addf %66, %70 : vector<1x128xf32>
    %c6_61 = arith.constant 6 : index
    %c0_62 = arith.constant 0 : index
    %72 = vector.load %arg6[%c6_61, %c0_62] : memref<8x128xf32, #tpu.memory_space<vmem>>, vector<1x128xf32>
    tpu.vector_store %arg6[%c6_61, %c0_62], %71 {strides = array<i32>} : memref<8x128xf32, #tpu.memory_space<vmem>>, vector<1x128xf32>,
    %c7 = arith.constant 7 : index
    %c0_63 = arith.constant 0 : index
    %c0_64 = arith.constant 0 : index
    %73 = vector.load %arg4[%c7, %c0_63, %c0_64] : memref<8x72x128xf32, #tpu.memory_space<vmem>>, vector<1x72x128xf32>
    %74 = vector.shape_cast %73 : vector<1x72x128xf32> to vector<72x128xf32>
    %c0_65 = arith.constant 0 : index
    %c7_66 = arith.constant 7 : index
    %75 = vector.load %arg3[%c0_65, %c7_66] : memref<72x8xf32, #tpu.memory_space<vmem>>, vector<72x1xf32>
    %c7_67 = arith.constant 7 : index
    %c0_68 = arith.constant 0 : index
    %76 = vector.load %arg6[%c7_67, %c0_68] : memref<8x128xf32, #tpu.memory_space<vmem>>, vector<1x128xf32>
    %77 = vector.broadcast %75 : vector<72x1xf32> to vector<72x128xf32>
    %78 = arith.mulf %74, %77 : vector<72x128xf32>
    %cst_69 = arith.constant dense<0.000000e+00> : vector<128xf32>
    %79 = vector.multi_reduction <add>, %78, %cst_69 [0] : vector<72x128xf32> to vector<128xf32>
    %80 = vector.shape_cast %79 : vector<128xf32> to vector<1x128xf32>
    %81 = arith.addf %76, %80 : vector<1x128xf32>
    %c7_70 = arith.constant 7 : index
    %c0_71 = arith.constant 0 : index
    %82 = vector.load %arg6[%c7_70, %c0_71] : memref<8x128xf32, #tpu.memory_space<vmem>>, vector<1x128xf32>
    tpu.vector_store %arg6[%c7_70, %c0_71], %81 {strides = array<i32>} : memref<8x128xf32, #tpu.memory_space<vmem>>, vector<1x128xf32>,
    %c0_i32_72 = arith.constant 0 : i32
    %83 = arith.cmpi eq, %arg1, %c0_i32_72 : i32
    %84 = arith.extui %83 : i1 to i32
    %c0_i32_73 = arith.constant 0 : i32
    %85 = arith.cmpi ne, %84, %c0_i32_73 : i32
    scf.if %85 {
      %c0_74 = arith.constant 0 : index
      %c0_75 = arith.constant 0 : index
      %86 = vector.load %arg2[%c0_74, %c0_75] : memref<8x8xf32, #tpu.memory_space<vmem>>, vector<8x8xf32>
      %c0_76 = arith.constant 0 : index
      %c0_77 = arith.constant 0 : index
      %87 = vector.load %arg6[%c0_76, %c0_77] : memref<8x128xf32, #tpu.memory_space<vmem>>, vector<8x128xf32>
      %cst_78 = arith.constant dense<0.000000e+00> : vector<8x128xf32>
      %88 = tpu.matmul %86, %87, %cst_78 {dimension_numbers = #tpu.dot_dimension_numbers<[1], [0], [0], [1], [0, 0, 1, 1], [], []>} : vector<8x8xf32>, vector<8x128xf32>, vector<8x128xf32> -> vector<8x128xf32>
      %c0_79 = arith.constant 0 : index
      %c0_80 = arith.constant 0 : index
      %89 = vector.load %arg5[%c0_79, %c0_80] : memref<8x128xf32, #tpu.memory_space<vmem>>, vector<8x128xf32>
      tpu.vector_store %arg5[%c0_79, %c0_80], %88 {strides = array<i32>} : memref<8x128xf32, #tpu.memory_space<vmem>>, vector<8x128xf32>,
    } else {
    }
    return
  }
  func.func @transform_0(%arg0: i32, %arg1: i32) -> (i32, i32) {
    %c0_i32 = arith.constant 0 : i32
    %c0_i32_0 = arith.constant 0 : i32
    %c0_i32_1 = arith.constant 0 : i32
    return %c0_i32, %c0_i32_0 : i32, i32
  }
  func.func @transform_1(%arg0: i32, %arg1: i32) -> (i32, i32) {
    %c0_i32 = arith.constant 0 : i32
    %c0_i32_0 = arith.constant 0 : i32
    return %arg1, %c0_i32 : i32, i32
  }
  func.func @transform_2(%arg0: i32, %arg1: i32) -> (i32, i32, i32) {
    %c0_i32 = arith.constant 0 : i32
    %c0_i32_0 = arith.constant 0 : i32
    return %c0_i32, %arg1, %arg0 : i32, i32, i32
  }
  func.func @transform_3(%arg0: i32, %arg1: i32) -> (i32, i32) {
    %c0_i32 = arith.constant 0 : i32
    %c0_i32_0 = arith.constant 0 : i32
    return %c0_i32, %arg0 : i32, i32
  }
}

</mosaic_0001>

<bundles_post_ra>
// kernel: tpu_custom_call.1
= control target key start
LH: loop header
LB: loop body
LE: loop exit
PB: predicated region body
PF: predicated region fallthrough
CT: control target
= control target key end

     0   :  { %8 = vsyncpa [#allocation4], 0  ;;  %s1836_s0 = inlined_call_operand.vmem [shape: f32[8,8], index: 0, kind: input, shape index: {}]   ;;  %s1837_s1 = inlined_call_operand.vmem [shape: f32[72,8], index: 1, kind: input, shape index: {}]   ;;  %s1838_s2 = inlined_call_operand.hbm [shape: f32[8,72,256], index: 2, kind: input, shape index: {}]   ;;  %s1839_s3 = inlined_call_operand.hbm [shape: f32[8,256], index: 3, kind: output, shape index: {}]  }
   0x1   :  { %10 = vsyncpa [#allocation4 + $0x1], 0 }
   0x2   :  { %11 = vsyncpa [#allocation5], 0 }
   0x3   :  { %13 = vsyncpa [#allocation5 + $0x1], 0  ;;  %s1439_s12 = smov 0   ;;  %s1441_s13 = smov 0  }
   0x4   :  { %s1443_s14 = smov 0   ;;  %s1445_s15 = smov 0  }
   0x5   :  { %s1447_s16 = smov 0   ;;  %s1449_s17 = smov 0  }
   0x6 LB: > { %s1095_s18 = sadd.s32 4294967295, %s1405_s17   ;;  %s1096_s19 = sadd.s32 4294967294, %s1405_s17   ;;  %s1405_s17 = sphi %s1449_s17, %s19_s17   ;;  %s1401_s16 = sphi %s1447_s16, %s1848_s16   ;;  %s1397_s15 = sphi %s1445_s15, %s1847_s15   ;;  %s1393_s14 = sphi %s1443_s14, %s1846_s14   ;;  %s1389_s13 = sphi %s1441_s13, %s1845_s13   ;;  %s1385_s12 = sphi %s1439_s12, %s1844_s12  }
   0x7   : > { %s31_s20 = sadd.s32 1, %s1401_s16  ;;  %s87_s21 = sadd.s32 1, %s1393_s14 }
   0x8   : > { %p33_p0 = scmp.ge.s32.totalorder %s31_s20, 2  ;;  %p94_p1 = scmp.ne.s32.totalorder %s1393_s14, %s1389_s13 }
   0x9   : > { %p95_p2 = scmp.eq.s32.totalorder %s1405_s17, 0  ;;  %p100_p3 = scmp.ne.s32.totalorder %s1389_s13, %s1385_s12 }
   0xa   : > { %s1850_s20 = smov (%p33_p0, %s31_s20), 0  ;;  %p101_p5 = scmp.eq.s32.totalorder %s1095_s18, 0 }
   0xb   : > { %p1480_p4 = por %p95_p2, %p94_p1  ;;  %s83_s23 = ssub.s32 %s1401_s16, %s1850_s20 }
   0xc   : > { %p124_p6 = scmp.eq.s32.totalorder %s1095_s18, 1  ;;  %p85_p7 = scmp.eq.s32.totalorder %s83_s23, 0 }
   0xd   : > { %p1486_p8 = por %p101_p5, %p100_p3  ;;  %p130_p10 = scmp.eq.s32.totalorder %s1096_s19, 1 }
   0xe   : > { %p1490_p9 = por %p124_p6, %p94_p1  ;;  %p1099_p12 = scmp.ge.s32.totalorder %s1405_s17, 2 }
   0xf   : > { %s1495_s26 = scalar_select %p85_p7, %s1393_s14, %s87_s21  }
  0x10   : > { %p1497_p11 = por %p130_p10, %p100_p3  ;;  %p1185_p13 = scmp.lt.s32.totalorder %s1405_s17, 2 }
  0x11   : > { %s162_s28 = sand.u32 1, %s1393_s14   ;;  %s1100_s30 = sshll.u32 %s1401_s16, 3 }
  0x12   : > { %s1171_s29 = smul.u32 576, %s162_s28  ;;  %p1178_p0 = pnand %p1185_p13, %p1480_p4 }
  0x13   : > { %s173_s6 = scalar_lea.hbm %s1838_s2, %s1100_s30  ;;  %s163_s10 = scalar_lea.sflag [#allocation4], %s162_s28 }
  0x14   : > { %s174_s7 = sshll.u32 %s173_s6, 4  ;;  %s166_s8 = scalar_lea.vmem [#allocation3], %s1171_s29  ;;  %s175_s7 = int_to_ptr.hbm [resolvable:$true] %s174_s7 }
  0x15   : > { %s176_s9 = sshll.u32 %s166_s8, 4  ;;  %s1407_s11 = smov 256   ;;  %s177_s9 = int_to_ptr.vmem [resolvable:$true] %s176_s9 }
  0x16   : > { %s1408_s18 = smov 128   ;;  %s1409_s19 = smov 8  }
  0x17   : > { %1180 = dma.hbm_to_vmem [thread:$0]  (!%p1178_p0), %s175_s7, 9216, %s177_s9, %s163_s10, %s1407_s11, %s1408_s18, %s1409_s19  }
  0x18   : > { %p1101_p1 = scmp.ge.s32.totalorder %s1405_s17, 1  ;;  %p184_p2 = scmp.lt.s32.totalorder %s1405_s17, 3 }
  0x1a   : > { %p185_p3 = pnand %p1101_p1, %p184_p2 }
  0x1b   : > { %s1513_s21 = sand.u32 (!%p185_p3), 1, %s1389_s13  }
  0x1c   : > { %188 = sbr.rel (%p185_p3) target bundleno = 534 (0x216), region = 32  ;;  %s191_s23 = scalar_lea.sflag (!%p185_p3), [#allocation4], %s1513_s21 }
  0x1d   : > { %s1172_s22 = smul.u32 (!%p185_p3), 576, %s1513_s21 }
  0x1f   : > { %s1517_s29 = scalar_lea.vmem (!%p185_p3), [#allocation3], %s1172_s22 }
  0x21   : > { %1376 = dma.done.wait (%p1486_p8), %s191_s23, 9216  }
  0x22   : > { %1378 = vsyncadd (%p1486_p8), %s191_s23, 4294958080  ;;  %v1410_v0 = vmov 0   ;;  %v1526_v1 = vld [vmem:[%s1837_s1 + $0x20] sm:$0xff]  ;;  %v1531_v2 = vld [vmem:[%s1837_s1 + $0x10] sm:$0xff]  ;;  %v1411_v10 = vmov 1   ;;  %v1412_v11 = vmov 2  }
  0x23   : > { %1249 = vset.pattern.permute.xlu2 %v1410_v0  ;;  %1248 = vset.pattern.permute.xlu1 %v1410_v0  ;;  %v1536_v3 = vld [vmem:[%s1837_s1] sm:$0xff]  ;;  %v1544_v4 = vld [vmem:[%s1837_s1 + $0x28] sm:$0xff]  ;;  %v1549_v5 = vld [vmem:[%s1837_s1 + $0x18] sm:$0xff]  ;;  %v1413_v12 = vmov 3   ;;  %v1414_v13 = vmov 5   ;;  %v1415_v15 = vmov 6  }
  0x24   : > { %1247 = vset.pattern.permute.xlu0 %v1410_v0  ;;  %276 = vperm.xlu2 %1249, %v1526_v1   ;;  %v1554_v6 = vld [vmem:[%s1837_s1 + $0x8] sm:$0xff]  ;;  %v1562_v7 = vld [vmem:[%s1837_s1 + $0x40] sm:$0xff]  ;;  %v1567_v8 = vld [vmem:[%s1837_s1 + $0x38] sm:$0xff]  ;;  %v1416_v17 = vmov 0.0   ;;  %v1417_v19 = vmov 4   ;;  %v1418_v24 = vmov 7  }
  0x25   : > { %266 = vperm.xlu1 %1248, %v1531_v2   ;;  %256 = vperm.xlu0 %1247, %v1536_v3   ;;  %v1572_v9 = vld [vmem:[%s1837_s1 + $0x30] sm:$0xff]  ;;  %234 = vst [vmem:[#allocation2] sm:$0xff] %v1416_v17  ;;  %v235_v23 = vld [vmem:[%s1517_s29] sm:$0xff]  ;;  %v237_v28 = vld [vmem:[%s1517_s29 + $0x10] sm:$0xff]  ;;  %vm959_vm0 = vcmask 64512   ;;  %s1102_s6 = sshll.u32 %s1513_s21, 3 }
  0x26   : > { %v236_v25 = vld [vmem:[%s1517_s29 + $0x8] sm:$0xff]  ;;  %v238_v32 = vld [vmem:[%s1517_s29 + $0x18] sm:$0xff]  ;;  %v239_v35 = vld [vmem:[%s1517_s29 + $0x20] sm:$0xff]  ;;  %s1168_s7 = sshll.u32 %s1397_s15, 3  ;;  %s222_s10 = scalar_lea.vmem [#allocation6], %s1102_s6 }
  0x27   : > { %v240_v38 = vld [vmem:[%s1517_s29 + $0x28] sm:$0xff]  ;;  %v241_v39 = vld [vmem:[%s1517_s29 + $0x30] sm:$0xff]  ;;  %v242_v48 = vld [vmem:[%s1517_s29 + $0x38] sm:$0xff]  ;;  %s995_s9 = scalar_lea.hbm %s1839_s3, %s1168_s7  ;;  %s997_s11 = sshll.u32 %s222_s10, 4  ;;  %s998_s11 = int_to_ptr.vmem [resolvable:$true] %s997_s11 }
  0x28   : > { %v243_v50 = vld [vmem:[%s1517_s29 + $0x40] sm:$0xff]  ;;  %v1104_v55 = vld [vmem:[%s1517_s29 + $0x50] sm:$0xff]  ;;  %v1103_v56 = vld [vmem:[%s1517_s29 + $0x48] sm:$0xff]  ;;  %s999_s18 = sshll.u32 %s995_s9, 4  ;;  %s985_s19 = scalar_lea.sflag [#allocation5], %s1513_s21  ;;  %s1000_s18 = int_to_ptr.hbm [resolvable:$true] %s999_s18 }
  0x29   : > { %v1105_v0 = vld [vmem:[%s1517_s29 + $0x58] sm:$0xff]  ;;  %s1337_s22 = sshra.s32 %s1000_s18, 4  ;;  %s1343_s30 = scalar_lea.hbm %s1839_s3, 16  ;;  %s1338_s22 = int_to_ptr.hbm [resolvable:$true] %s1337_s22 }
  0x2a   : > { %s1339_s23 = scalar_lea.hbm %s1338_s22, 8  ;;  %p1344_p7 = scmp.lt.s32.totalorder %s1338_s22, %s1839_s3 }
  0x2b   : > { %p1340_p4 = scmp.ne.s32.totalorder %s1338_s22, %s1339_s23  ;;  %p1345_p8 = scmp.lt.s32.totalorder %s1343_s30, %s1339_s23 }
  0x2c   : > { %281 = vperm.xlu2 %1249, %v1544_v4  }
  0x2d   : > { %271 = vperm.xlu1 %1248, %v1549_v5   ;;  %261 = vperm.xlu0 %1247, %v1554_v6   ;;  %p1341_p5 = pnand %p1340_p4, %p1490_p9  ;;  %p1346_p10 = por %p1345_p8, %p1344_p7 }
  0x2f   : > { %p1342_p6 = pneg %p1341_p5 }
  0x31   : > { %p1347_p13 = pnand %p1346_p10, %p1342_p6 }
  0x34   : > { %296 = vperm.xlu2 %1249, %v1562_v7  }
  0x35   : > { %291 = vperm.xlu1 %1248, %v1567_v8   ;;  %286 = vperm.xlu0 %1247, %v1572_v9  }
  0x3c   : > { %1252 = vset.pattern.permute.xlu2 %v1411_v10 }
  0x3d   : > { %1251 = vset.pattern.permute.xlu1 %v1411_v10  ;;  %1250 = vset.pattern.permute.xlu0 %v1411_v10 }
  0x3e   : > { %356 = vperm.xlu2 %1252, %v1531_v2   ;;  %351 = vperm.xlu1 %1251, %v1554_v6  }
  0x3f   : > { %346 = vperm.xlu0 %1250, %v1536_v3  }
  0x46   : > { %366 = vperm.xlu2 %1252, %v1526_v1   ;;  %361 = vperm.xlu1 %1251, %v1549_v5  }
  0x47   : > { %371 = vperm.xlu0 %1250, %v1544_v4  }
  0x4e   : > { %381 = vperm.xlu2 %1252, %v1567_v8   ;;  %376 = vperm.xlu1 %1251, %v1572_v9  }
  0x4f   : > { %386 = vperm.xlu0 %1250, %v1562_v7  }
  0x56   : > { %1254 = vset.pattern.permute.xlu2 %v1412_v11  ;;  %1253 = vset.pattern.permute.xlu1 %v1412_v11 }
  0x57   : > { %1255 = vset.pattern.permute.xlu0 %v1412_v11  ;;  %441 = vperm.xlu2 %1254, %v1554_v6   ;;  %v1106_v11 = vld [vmem:[%s1517_s29 + $0x60] sm:$0xff] }
  0x58   : > { %436 = vperm.xlu1 %1253, %v1536_v3   ;;  %446 = vperm.xlu0 %1255, %v1531_v2  }
  0x5f   : > { %456 = vperm.xlu2 %1254, %v1526_v1  }
  0x60   : > { %451 = vperm.xlu1 %1253, %v1549_v5   ;;  %471 = vperm.xlu0 %1255, %v1567_v8  }
  0x67   : > { %466 = vperm.xlu2 %1254, %v1572_v9  }
  0x68   : > { %461 = vperm.xlu1 %1253, %v1544_v4   ;;  %1257 = vset.pattern.permute.xlu0 %v1413_v12 }
  0x69   : > { %531 = vperm.xlu0 %1257, %v1554_v6  }
  0x6f   : > { %1256 = vset.pattern.permute.xlu2 %v1413_v12 }
  0x70   : > { %476 = vperm.xlu1 %1253, %v1562_v7   ;;  %526 = vperm.xlu2 %1256, %v1536_v3  }
  0x71   : > { %556 = vperm.xlu0 %1257, %v1572_v9  }
  0x78   : > { %1258 = vset.pattern.permute.xlu1 %v1413_v12  ;;  %541 = vperm.xlu2 %1256, %v1549_v5  }
  0x79   : > { %536 = vperm.xlu1 %1258, %v1531_v2   ;;  %1269 = vset.pattern.permute.xlu0 %v1414_v13 }
  0x7a   : > { %721 = vperm.xlu0 %1269, %v1549_v5  }
  0x7e   : > { %v277_v14 = vpop.permute.xlu2 %276 }
  0x7f   : > { %v303_v40 = vmul.f32 %v277_v14, %v239_v35  ;;  %v1107_v14 = vld [vmem:[%s1517_s29 + $0x68] sm:$0xff] }
  0x80   : > { %551 = vperm.xlu2 %1256, %v1544_v4   ;;  %v1111_v35 = vld [vmem:[%s1517_s29 + $0x88] sm:$0xff] }
  0x81   : > { %546 = vperm.xlu1 %1258, %v1526_v1  }
  0x82   : > { %1270 = vset.pattern.permute.xlu0 %v1415_v15 }
  0x83   : > { %801 = vperm.xlu0 %1270, %v1554_v6  }
  0x86   : > { %v282_v16 = vpop.permute.xlu2 %281 }
  0x87   : > { %v304_v45 = vmul.f32 %v282_v16, %v240_v38 }
  0x88   : > { %566 = vperm.xlu2 %1256, %v1562_v7  }
  0x89   : > { %561 = vperm.xlu1 %1258, %v1567_v8  }
  0x8b   : > { %806 = vperm.xlu0 %1270, %v1531_v2  }
  0x8e   : > { %v297_v18 = vpop.permute.xlu2 %296 }
  0x8f   : > { %v307_v53 = vmul.f32 %v297_v18, %v243_v50 }
  0x90   : > { %1260 = vset.pattern.permute.xlu2 %v1414_v13 }
  0x91   : > { %1259 = vset.pattern.permute.xlu1 %v1417_v19  ;;  %706 = vperm.xlu2 %1260, %v1536_v3  }
  0x92   : > { %621 = vperm.xlu1 %1259, %v1554_v6  }
  0x93   : > { %816 = vperm.xlu0 %1270, %v1526_v1  }
  0x97   : > { %v267_v20 = vpop.permute.xlu1 %266  ;;  %v257_v21 = vpop.permute.xlu0 %256 }
  0x98   : > { %v1614_v22 = vpop.permute.xlu2 %356  ;;  %v299_v26 = vmul.f32 %v257_v21, %v235_v23  ;;  %v301_v33 = vmul.f32 %v267_v20, %v237_v28 }
  0x99   : > { %1262 = vset.pattern.permute.xlu2 %v1415_v15  ;;  %v391_v12 = vmul.f32 %v1105_v0, %v1614_v22 }
  0x9a   : > { %1261 = vset.pattern.permute.xlu1 %v1414_v13  ;;  %796 = vperm.xlu2 %1262, %v1536_v3  }
  0x9b   : > { %711 = vperm.xlu1 %1261, %v1554_v6   ;;  %1279 = vset.pattern.permute.xlu0 %v1418_v24 }
  0x9c   : > { %911 = vperm.xlu0 %1279, %v1544_v4  }
  0x9f   : > { %v272_v27 = vpop.permute.xlu1 %271  ;;  %v262_v29 = vpop.permute.xlu0 %261 }
  0xa0   : > { %v1625_v30 = vpop.permute.xlu2 %366  ;;  %v300_v31 = vmul.f32 %v262_v29, %v236_v25  ;;  %v302_v36 = vmul.f32 %v272_v27, %v238_v32  ;;  %v253_v27 = vld [vmem:[#allocation2] sm:$0x1] }
  0xa2   : > { %v308_v34 = vadd.f32 %v300_v31, %v299_v26  ;;  %1264 = vset.pattern.permute.xlu2 %v1418_v24  ;;  %v393_v26 = vmul.f32 %v1107_v14, %v1625_v30  ;;  %v1110_v30 = vld [vmem:[%s1517_s29 + $0x80] sm:$0xff]  ;;  %v1117_v14 = vld [vmem:[%s1517_s29 + $0xb8] sm:$0xff] }
  0xa3   : > { %1263 = vset.pattern.permute.xlu1 %v1418_v24  ;;  %891 = vperm.xlu2 %1264, %v1554_v6  }
  0xa4   : > { %886 = vperm.xlu1 %1263, %v1536_v3   ;;  %v309_v37 = vadd.f32 %v308_v34, %v301_v33  ;;  %1280 = vset.pattern.permute.xlu0 %v1417_v19  ;;  %v1109_v33 = vld [vmem:[%s1517_s29 + $0x78] sm:$0xff] }
  0xa5   : > { %616 = vperm.xlu0 %1280, %v1536_v3  }
  0xa6   : > { %v310_v41 = vadd.f32 %v309_v37, %v302_v36 }
  0xa7   : > { %v292_v42 = vpop.permute.xlu1 %291  ;;  %v287_v43 = vpop.permute.xlu0 %286 }
  0xa8   : > { %v1637_v44 = vpop.permute.xlu2 %381  ;;  %v305_v46 = vmul.f32 %v287_v43, %v241_v39  ;;  %v311_v47 = vadd.f32 %v310_v41, %v303_v40  ;;  %v306_v51 = vmul.f32 %v292_v42, %v242_v48 }
  0xa9   : > { %v396_v40 = vmul.f32 %v1110_v30, %v1637_v44 }
  0xaa   : > { %v312_v49 = vadd.f32 %v311_v47, %v304_v45  ;;  %v1113_v45 = vld [vmem:[%s1517_s29 + $0x98] sm:$0xff]  ;;  %v1112_v47 = vld [vmem:[%s1517_s29 + $0x90] sm:$0xff] }
  0xab   : > { %1266 = vset.pattern.permute.xlu2 %v1414_v13 }
  0xac   : > { %1265 = vset.pattern.permute.xlu1 %v1417_v19  ;;  %v313_v52 = vadd.f32 %v312_v49, %v305_v46  ;;  %716 = vperm.xlu2 %1266, %v1531_v2  }
  0xad   : > { %626 = vperm.xlu1 %1265, %v1531_v2   ;;  %651 = vperm.xlu0 %1280, %v1567_v8  }
  0xae   : > { %v314_v54 = vadd.f32 %v313_v52, %v306_v51 }
  0xb0   : > { %v315_v57 = vadd.f32 %v314_v54, %v307_v53  ;;  %v352_v58 = vpop.permute.xlu1 %351  ;;  %v1114_v54 = vld [vmem:[%s1517_s29 + $0xa0] sm:$0xff] }
  0xb1   : > { %v347_v59 = vpop.permute.xlu0 %346  ;;  %v390_v60 = vmul.f32 %v1104_v55, %v352_v58  ;;  %v442_v62 = vpop.permute.xlu2 %441 }
  0xb2   : > { %v389_v61 = vmul.f32 %v1103_v56, %v347_v59  ;;  %v316_v63 = vrot.slane %v315_v57, 4  ;;  %v480_v51 = vmul.f32 %v1113_v45, %v442_v62  ;;  %v1115_v56 = vld [vmem:[%s1517_s29 + $0xa8] sm:$0xff] }
  0xb4   : > { %v317_v3 = vadd.f32 %v316_v63, %v315_v57  ;;  %1268 = vset.pattern.permute.xlu2 %v1417_v19  ;;  %v398_v6 = vadd.f32 %v390_v60, %v389_v61  ;;  %v343_v61 = vld [vmem:[#allocation2 + $0x1] sm:$0x1] }
  0xb5   : > { %1267 = vset.pattern.permute.xlu1 %v1418_v24  ;;  %631 = vperm.xlu2 %1268, %v1549_v5  }
  0xb6   : > { %896 = vperm.xlu1 %1267, %v1531_v2   ;;  %v318_v10 = vrot.slane %v317_v3, 2  ;;  %1289 = vset.pattern.permute.xlu0 %v1414_v13  ;;  %v399_v21 = vadd.f32 %v398_v6, %v391_v12  ;;  %v1108_v2 = vld [vmem:[%s1517_s29 + $0x70] sm:$0xff] }
  0xb7   : > { %746 = vperm.xlu0 %1289, %v1562_v7  }
  0xb8   : > { %v319_v16 = vadd.f32 %v318_v10, %v317_v3  ;;  %v362_v17 = vpop.permute.xlu1 %361  ;;  %v1116_v10 = vld [vmem:[%s1517_s29 + $0xb0] sm:$0xff] }
  0xb9   : > { %v372_v18 = vpop.permute.xlu0 %371  ;;  %v392_v20 = vmul.f32 %v1106_v11, %v362_v17  ;;  %v1658_v23 = vpop.permute.xlu2 %456 }
  0xba   : > { %v320_v25 = vrot.slane %v319_v16, 1  ;;  %v394_v31 = vmul.f32 %v1108_v2, %v372_v18 }
  0xbb   : > { %v400_v28 = vadd.f32 %v399_v21, %v392_v20 }
  0xbc   : > { %v321_v22 = vadd.f32 %v320_v25, %v319_v16  ;;  %v483_v16 = vmul.f32 %v1116_v10, %v1658_v23  ;;  %v1119_v25 = vld [vmem:[%s1517_s29 + $0xc8] sm:$0xff] }
  0xbd   : > { %v401_v29 = vadd.f32 %v400_v28, %v393_v26  ;;  %1272 = vset.pattern.permute.xlu2 %v1418_v24 }
  0xbe   : > { %1271 = vset.pattern.permute.xlu1 %v1415_v15  ;;  %v322_v32 = vadd.f32 %v321_v22, %v253_v27  ;;  %901 = vperm.xlu2 %1272, %v1549_v5   ;;  %v1120_v22 = vld [vmem:[%s1517_s29 + $0xd0] sm:$0xff] }
  0xbf   : > { %811 = vperm.xlu1 %1271, %v1549_v5   ;;  %1292 = vset.pattern.permute.xlu0 %v1418_v24  ;;  %v402_v37 = vadd.f32 %v401_v29, %v394_v31 }
  0xc0   : > { %323 = vst [vmem:[#allocation2] sm:$0x1] %v322_v32  ;;  %v377_v34 = vpop.permute.xlu1 %376 }
  0xc1   : > { %v387_v36 = vpop.permute.xlu0 %386  ;;  %v395_v38 = vmul.f32 %v1109_v33, %v377_v34  ;;  %v467_v39 = vpop.permute.xlu2 %466  ;;  %v1121_v34 = vld [vmem:[%s1517_s29 + $0xd8] sm:$0xff] }
  0xc2   : > { %v397_v42 = vmul.f32 %v1111_v35, %v387_v36  ;;  %v1122_v35 = vld [vmem:[%s1517_s29 + $0xe0] sm:$0xff] }
  0xc3   : > { %v403_v41 = vadd.f32 %v402_v37, %v395_v38  ;;  %v1123_v38 = vld [vmem:[%s1517_s29 + $0xe8] sm:$0xff] }
  0xc5   : > { %v404_v43 = vadd.f32 %v403_v41, %v396_v40 }
  0xc6   : > { %1274 = vset.pattern.permute.xlu2 %v1414_v13 }
  0xc7   : > { %1273 = vset.pattern.permute.xlu1 %v1417_v19  ;;  %v405_v5 = vadd.f32 %v404_v43, %v397_v42  ;;  %726 = vperm.xlu2 %1274, %v1526_v1  }
  0xc8   : > { %636 = vperm.xlu1 %1273, %v1526_v1  }
  0xc9   : > { %v406_v46 = vrot.slane %v405_v5, 4 }
  0xca   : > { %v437_v48 = vpop.permute.xlu1 %436  ;;  %v527_v49 = vpop.permute.xlu2 %526 }
  0xcb   : > { %v447_v44 = vpop.permute.xlu0 %446  ;;  %v407_v50 = vadd.f32 %v406_v46, %v405_v5  ;;  %v479_v52 = vmul.f32 %v1112_v47, %v437_v48  ;;  %v1124_v48 = vld [vmem:[%s1517_s29 + $0xf0] sm:$0xff] }
  0xcc   : > { %v481_v58 = vmul.f32 %v1114_v54, %v447_v44  ;;  %v433_v44 = vld [vmem:[#allocation2 + $0x2] sm:$0x1]  ;;  %v1126_v54 = vld [vmem:[%s1517_s29 + $0x100] sm:$0xff] }
  0xcd   : > { %v408_v53 = vrot.slane %v407_v50, 2  ;;  %v488_v57 = vadd.f32 %v480_v51, %v479_v52  ;;  %v1125_v52 = vld [vmem:[%s1517_s29 + $0xf8] sm:$0xff] }
  0xcf   : > { %v409_v55 = vadd.f32 %v408_v53, %v407_v50  ;;  %1276 = vset.pattern.permute.xlu2 %v1417_v19  ;;  %v489_v6 = vadd.f32 %v488_v57, %v481_v58  ;;  %v1148_v57 = vld [vmem:[%s1517_s29 + $0x1b0] sm:$0xff] }
  0xd0   : > { %1275 = vset.pattern.permute.xlu1 %v1418_v24  ;;  %641 = vperm.xlu2 %1276, %v1544_v4  }
  0xd1   : > { %906 = vperm.xlu1 %1275, %v1526_v1   ;;  %v410_v59 = vrot.slane %v409_v55, 1  ;;  %v1118_v1 = vld [vmem:[%s1517_s29 + $0xc0] sm:$0xff] }
  0xd2   : > { %v452_v60 = vpop.permute.xlu1 %451  ;;  %v542_v63 = vpop.permute.xlu2 %541  ;;  %v485_v26 = vmul.f32 %v1118_v1, %v467_v39  ;;  %v569_v39 = vmul.f32 %v1121_v34, %v527_v49 }
  0xd3   : > { %v482_v62 = vmul.f32 %v1115_v56, %v452_v60  ;;  %v472_v0 = vpop.permute.xlu0 %471  ;;  %v411_v3 = vadd.f32 %v410_v59, %v409_v55  ;;  %v572_v53 = vmul.f32 %v1124_v48, %v542_v63  ;;  %v1149_v59 = vld [vmem:[%s1517_s29 + $0x1b8] sm:$0xff]  ;;  %v1127_v60 = vld [vmem:[%s1517_s29 + $0x108] sm:$0xff]  ;;  %v1160_v48 = vld [vmem:[%s1517_s29 + $0x210] sm:$0xff] }
  0xd4   : > { %v486_v27 = vmul.f32 %v1119_v25, %v472_v0 }
  0xd5   : > { %v412_v11 = vadd.f32 %v411_v3, %v343_v61  ;;  %v490_v12 = vadd.f32 %v489_v6, %v482_v62 }
  0xd7   : > { %413 = vst [vmem:[#allocation2 + $0x1] sm:$0x1] %v412_v11  ;;  %v491_v20 = vadd.f32 %v490_v12, %v483_v16  ;;  %v1128_v12 = vld [vmem:[%s1517_s29 + $0x110] sm:$0xff] }
  0xd8   : > { %1278 = vset.pattern.permute.xlu2 %v1415_v15 }
  0xd9   : > { %1277 = vset.pattern.permute.xlu1 %v1414_v13  ;;  %821 = vperm.xlu2 %1278, %v1544_v4  }
  0xda   : > { %731 = vperm.xlu1 %1277, %v1544_v4   ;;  %v462_v17 = vpop.permute.xlu1 %461  ;;  %v552_v21 = vpop.permute.xlu2 %551 }
  0xdb   : > { %v484_v18 = vmul.f32 %v1117_v14, %v462_v17  ;;  %v532_v2 = vpop.permute.xlu0 %531  ;;  %v574_v62 = vmul.f32 %v1126_v54, %v552_v21  ;;  %v1129_v14 = vld [vmem:[%s1517_s29 + $0x118] sm:$0xff] }
  0xdc   : > { %v570_v40 = vmul.f32 %v1122_v35, %v532_v2 }
  0xdd   : > { %v492_v23 = vadd.f32 %v491_v20, %v484_v18 }
  0xde   : > { %v578_v47 = vadd.f32 %v570_v40, %v569_v39 }
  0xdf   : > { %v493_v28 = vadd.f32 %v492_v23, %v485_v26 }
  0xe1   : > { %1282 = vset.pattern.permute.xlu2 %v1414_v13  ;;  %v494_v4 = vadd.f32 %v493_v28, %v486_v27  ;;  %v1139_v28 = vld [vmem:[%s1517_s29 + $0x168] sm:$0xff] }
  0xe2   : > { %1281 = vset.pattern.permute.xlu1 %v1417_v19  ;;  %v477_v29 = vpop.permute.xlu1 %476  ;;  %736 = vperm.xlu2 %1282, %v1572_v9   ;;  %v567_v32 = vpop.permute.xlu2 %566 }
  0xe3   : > { %v487_v31 = vmul.f32 %v1120_v22, %v477_v29  ;;  %646 = vperm.xlu1 %1281, %v1572_v9   ;;  %v557_v33 = vpop.permute.xlu0 %556  ;;  %v577_v18 = vmul.f32 %v1129_v14, %v567_v32  ;;  %v523_v29 = vld [vmem:[#allocation2 + $0x3] sm:$0x1] }
  0xe4   : > { %v575_v10 = vmul.f32 %v1127_v60, %v557_v33  ;;  %v1130_v60 = vld [vmem:[%s1517_s29 + $0x120] sm:$0xff] }
  0xe5   : > { %v495_v30 = vadd.f32 %v494_v4, %v487_v31  ;;  %v1141_v31 = vld [vmem:[%s1517_s29 + $0x178] sm:$0xff]  ;;  %v1140_v4 = vld [vmem:[%s1517_s29 + $0x170] sm:$0xff] }
  0xe7   : > { %v496_v36 = vrot.slane %v495_v30, 4 }
  0xe9   : > { %v497_v37 = vadd.f32 %v496_v36, %v495_v30  ;;  %v1158_v36 = vld [vmem:[%s1517_s29 + $0x200] sm:$0xff] }
  0xea   : > { %1284 = vset.pattern.permute.xlu2 %v1418_v24 }
  0xeb   : > { %v498_v41 = vrot.slane %v497_v37, 2  ;;  %1283 = vset.pattern.permute.xlu1 %v1415_v15  ;;  %v537_v42 = vpop.permute.xlu1 %536  ;;  %916 = vperm.xlu2 %1284, %v1572_v9   ;;  %v1704_v5 = vpop.permute.xlu2 %706 }
  0xec   : > { %v571_v43 = vmul.f32 %v1123_v38, %v537_v42  ;;  %826 = vperm.xlu1 %1283, %v1572_v9   ;;  %v1706_v46 = vpop.permute.xlu0 %721  ;;  %v749_v30 = vmul.f32 %v1139_v28, %v1704_v5  ;;  %v1157_v38 = vld [vmem:[%s1517_s29 + $0x1f8] sm:$0xff] }
  0xed   : > { %v499_v45 = vadd.f32 %v498_v41, %v497_v37 }
  0xee   : > { %v579_v50 = vadd.f32 %v578_v47, %v571_v43 }
  0xef   : > { %v500_v49 = vrot.slane %v499_v45, 1 }
  0xf0   : > { %v580_v58 = vadd.f32 %v579_v50, %v572_v53 }
  0xf1   : > { %v501_v51 = vadd.f32 %v500_v49, %v499_v45  ;;  %v1159_v49 = vld [vmem:[%s1517_s29 + $0x208] sm:$0xff] }
  0xf3   : > { %v502_v55 = vadd.f32 %v501_v51, %v433_v44  ;;  %v547_v56 = vpop.permute.xlu1 %546  ;;  %1286 = vset.pattern.permute.xlu2 %v1415_v15 }
  0xf4   : > { %v573_v9 = vmul.f32 %v1125_v52, %v547_v56  ;;  %1285 = vset.pattern.permute.xlu1 %v1414_v13  ;;  %831 = vperm.xlu2 %1286, %v1567_v8   ;;  %v797_v61 = vpop.permute.xlu2 %796 }
  0xf5   : > { %503 = vst [vmem:[#allocation2 + $0x2] sm:$0x1] %v502_v55  ;;  %741 = vperm.xlu1 %1285, %v1567_v8   ;;  %v802_v0 = vpop.permute.xlu0 %801  ;;  %v839_v3 = vmul.f32 %v1148_v57, %v797_v61 }
  0xf6   : > { %v581_v63 = vadd.f32 %v580_v58, %v573_v9  ;;  %v840_v6 = vmul.f32 %v1149_v59, %v802_v0  ;;  %v1132_v0 = vld [vmem:[%s1517_s29 + $0x130] sm:$0xff] }
  0xf8   : > { %v582_v11 = vadd.f32 %v581_v63, %v574_v62  ;;  %v1718_v13 = vadd.f32 %v840_v6, %v839_v3  ;;  %v1131_v63 = vld [vmem:[%s1517_s29 + $0x128] sm:$0xff] }
  0xfa   : > { %v583_v17 = vadd.f32 %v582_v11, %v575_v10 }
  0xfb   : > { %v562_v16 = vpop.permute.xlu1 %561 }
  0xfc   : > { %v576_v1 = vmul.f32 %v1128_v12, %v562_v16  ;;  %1288 = vset.pattern.permute.xlu2 %v1417_v19  ;;  %v1133_v12 = vld [vmem:[%s1517_s29 + $0x138] sm:$0xff]  ;;  %v1134_v16 = vld [vmem:[%s1517_s29 + $0x140] sm:$0xff] }
  0xfd   : > { %1287 = vset.pattern.permute.xlu1 %v1418_v24  ;;  %656 = vperm.xlu2 %1288, %v1562_v7   ;;  %v892_v21 = vpop.permute.xlu2 %891  ;;  %v1738_v5 = vpop.permute.xlu0 %806 }
  0xfe   : > { %v584_v20 = vadd.f32 %v583_v17, %v576_v1  ;;  %921 = vperm.xlu1 %1287, %v1567_v8   ;;  %v930_v39 = vmul.f32 %v1158_v36, %v892_v21  ;;  %v1135_v21 = vld [vmem:[%s1517_s29 + $0x148] sm:$0xff]  ;;  %v1144_v36 = vld [vmem:[%s1517_s29 + $0x190] sm:$0xff] }
 0x100   : > { %v585_v25 = vadd.f32 %v584_v20, %v577_v18 }
 0x102   : > { %v586_v2 = vrot.slane %v585_v25, 4 }
 0x104   : > { %v587_v26 = vadd.f32 %v586_v2, %v585_v25  ;;  %v622_v23 = vpop.permute.xlu1 %621 }
 0x105   : > { %1291 = vset.pattern.permute.xlu2 %v1418_v24  ;;  %v1744_v55 = vpop.permute.xlu0 %816  ;;  %v660_v10 = vmul.f32 %v1131_v63, %v622_v23  ;;  %v1137_v23 = vld [vmem:[%s1517_s29 + $0x158] sm:$0xff]  ;;  %v1162_v63 = vld [vmem:[%s1517_s29 + $0x220] sm:$0xff] }
 0x106   : > { %v588_v27 = vrot.slane %v587_v26, 2  ;;  %1290 = vset.pattern.permute.xlu1 %v1415_v15  ;;  %v717_v19 = vpop.permute.xlu2 %716  ;;  %926 = vperm.xlu2 %1291, %v1562_v7  }
 0x107   : > { %836 = vperm.xlu1 %1290, %v1562_v7   ;;  %v751_v34 = vmul.f32 %v1141_v31, %v717_v19  ;;  %v1136_v19 = vld [vmem:[%s1517_s29 + $0x150] sm:$0xff] }
 0x108   : > { %v589_v8 = vadd.f32 %v588_v27, %v587_v26 }
 0x10a   : > { %v590_v22 = vrot.slane %v589_v8, 1 }
 0x10c   : > { %v591_v32 = vadd.f32 %v590_v22, %v589_v8 }
 0x10d   : > { %v712_v33 = vpop.permute.xlu1 %711 }
 0x10e   : > { %v592_v15 = vadd.f32 %v591_v32, %v523_v29  ;;  %v750_v24 = vmul.f32 %v1140_v4, %v712_v33  ;;  %v1750_v9 = vpop.permute.xlu0 %911  ;;  %v1138_v4 = vld [vmem:[%s1517_s29 + $0x160] sm:$0xff] }
 0x10f   : > { %v632_v7 = vpop.permute.xlu2 %631 }
 0x110   : > { %593 = vst [vmem:[#allocation2 + $0x3] sm:$0x1] %v592_v15  ;;  %v758_v35 = vadd.f32 %v750_v24, %v749_v30  ;;  %v662_v1 = vmul.f32 %v1133_v12, %v632_v7  ;;  %v1142_v30 = vld [vmem:[%s1517_s29 + $0x180] sm:$0xff]  ;;  %v1143_v24 = vld [vmem:[%s1517_s29 + $0x188] sm:$0xff] }
 0x112   : > { %v1735_v37 = vadd.f32 %v758_v35, %v751_v34  ;;  %v752_v35 = vmul.f32 %v1142_v30, %v1706_v46 }
 0x116   : > { %v887_v40 = vpop.permute.xlu1 %886 }
 0x117   : > { %v929_v41 = vmul.f32 %v1157_v38, %v887_v40  ;;  %v617_v61 = vpop.permute.xlu0 %616 }
 0x118   : > { %v902_v43 = vpop.permute.xlu2 %901  ;;  %v659_v3 = vmul.f32 %v1130_v60, %v617_v61  ;;  %v1147_v60 = vld [vmem:[%s1517_s29 + $0x1a8] sm:$0xff] }
 0x119   : > { %v938_v42 = vadd.f32 %v930_v39, %v929_v41  ;;  %v932_v50 = vmul.f32 %v1160_v48, %v902_v43  ;;  %v760_v41 = vadd.f32 %v1735_v37, %v752_v35 }
 0x11a   : > { %v668_v14 = vadd.f32 %v660_v10, %v659_v3  ;;  %v613_v10 = vld [vmem:[#allocation2 + $0x4] sm:$0x1] }
 0x11f   : > { %v627_v45 = vpop.permute.xlu1 %626  ;;  %v652_v8 = vpop.permute.xlu0 %651 }
 0x120   : > { %v661_v11 = vmul.f32 %v1132_v0, %v627_v45  ;;  %v666_v31 = vmul.f32 %v1137_v23, %v652_v8  ;;  %v1145_v45 = vld [vmem:[%s1517_s29 + $0x198] sm:$0xff] }
 0x121   : > { %v727_v47 = vpop.permute.xlu2 %726 }
 0x122   : > { %v669_v17 = vadd.f32 %v668_v14, %v661_v11  ;;  %v753_v38 = vmul.f32 %v1143_v24, %v727_v47 }
 0x124   : > { %v670_v2 = vadd.f32 %v669_v17, %v662_v1  ;;  %v761_v48 = vadd.f32 %v760_v41, %v753_v38  ;;  %v1152_v1 = vld [vmem:[%s1517_s29 + $0x1d0] sm:$0xff]  ;;  %v703_v41 = vld [vmem:[#allocation2 + $0x5] sm:$0x1] }
 0x128   : > { %v897_v44 = vpop.permute.xlu1 %896 }
 0x129   : > { %v931_v51 = vmul.f32 %v1159_v49, %v897_v44  ;;  %v1161_v49 = vld [vmem:[%s1517_s29 + $0x218] sm:$0xff]  ;;  %v747_v61 = vpop.permute.xlu0 %746 }
 0x12a   : > { %v642_v53 = vpop.permute.xlu2 %641 }
 0x12b   : > { %v939_v52 = vadd.f32 %v938_v42, %v931_v51  ;;  %v664_v26 = vmul.f32 %v1135_v21, %v642_v53  ;;  %v1151_v51 = vld [vmem:[%s1517_s29 + $0x1c8] sm:$0xff]  ;;  %v843_v21 = vmul.f32 %v1152_v1, %v1744_v55 }
 0x12d   : > { %v1742_v54 = vadd.f32 %v939_v52, %v932_v50  ;;  %v1150_v50 = vld [vmem:[%s1517_s29 + $0x1c0] sm:$0xff] }
 0x12e   : > { %v841_v37 = vmul.f32 %v1150_v50, %v1738_v5 }
 0x130   : > { %v849_v5 = vadd.f32 %v1718_v13, %v841_v37 }
 0x131   : > { %v1746_v56 = vpop.permute.xlu1 %811 }
 0x132   : > { %v842_v3 = vmul.f32 %v1151_v51, %v1746_v56 }
 0x133   : > { %v1748_v57 = vpop.permute.xlu2 %821 }
 0x13a   : > { %v637_v58 = vpop.permute.xlu1 %636 }
 0x13b   : > { %v663_v20 = vmul.f32 %v1134_v16, %v637_v58  ;;  %v1146_v58 = vld [vmem:[%s1517_s29 + $0x1a0] sm:$0xff]  ;;  %v757_v16 = vmul.f32 %v1147_v60, %v747_v61 }
 0x13c   : > { %v737_v59 = vpop.permute.xlu2 %736 }
 0x13d   : > { %v671_v27 = vadd.f32 %v670_v2, %v663_v20  ;;  %v755_v52 = vmul.f32 %v1145_v45, %v737_v59  ;;  %v850_v2 = vadd.f32 %v849_v5, %v842_v3 }
 0x13f   : > { %v672_v29 = vadd.f32 %v671_v27, %v664_v26  ;;  %v1153_v27 = vld [vmem:[%s1517_s29 + $0x1d8] sm:$0xff] }
 0x140   : > { %v844_v13 = vmul.f32 %v1153_v27, %v1748_v57 }
 0x143   : > { %v907_v62 = vpop.permute.xlu1 %906 }
 0x144   : > { %v933_v47 = vmul.f32 %v1161_v49, %v907_v62  ;;  %v934_v62 = vmul.f32 %v1162_v63, %v1750_v9  ;;  %v1164_v9 = vld [vmem:[%s1517_s29 + $0x230] sm:$0xff] }
 0x145   : > { %v1755_v6 = vpop.permute.xlu2 %916 }
 0x146   : > { %v941_v17 = vadd.f32 %v1742_v54, %v933_v47  ;;  %v883_v47 = vld [vmem:[#allocation2 + $0x7] sm:$0x1] }
 0x148   : > { %v942_v23 = vadd.f32 %v941_v17, %v934_v62 }
 0x14c   : > { %v732_v18 = vpop.permute.xlu1 %731 }
 0x14d   : > { %v754_v42 = vmul.f32 %v1144_v36, %v732_v18  ;;  %v1163_v18 = vld [vmem:[%s1517_s29 + $0x228] sm:$0xff] }
 0x14e   : > { %v1760_v25 = vpop.permute.xlu2 %831 }
 0x14f   : > { %v762_v46 = vadd.f32 %v761_v48, %v754_v42  ;;  %v1156_v42 = vld [vmem:[%s1517_s29 + $0x1f0] sm:$0xff] }
 0x151   : > { %v763_v59 = vadd.f32 %v762_v46, %v755_v52 }
 0x155   : > { %v647_v28 = vpop.permute.xlu1 %646 }
 0x156   : > { %v665_v22 = vmul.f32 %v1136_v19, %v647_v28  ;;  %v935_v19 = vmul.f32 %v1163_v18, %v1755_v6  ;;  %v1165_v28 = vld [vmem:[%s1517_s29 + $0x238] sm:$0xff] }
 0x157   : > { %v657_v33 = vpop.permute.xlu2 %656 }
 0x158   : > { %v673_v32 = vadd.f32 %v672_v29, %v665_v22  ;;  %v667_v15 = vmul.f32 %v1138_v4, %v657_v33  ;;  %v1154_v22 = vld [vmem:[%s1517_s29 + $0x1e0] sm:$0xff]  ;;  %v851_v29 = vadd.f32 %v850_v2, %v843_v21  ;;  %v943_v55 = vadd.f32 %v942_v23, %v935_v19 }
 0x15a   : > { %v674_v34 = vadd.f32 %v673_v32, %v666_v31  ;;  %v852_v24 = vadd.f32 %v851_v29, %v844_v13 }
 0x15c   : > { %v675_v7 = vadd.f32 %v674_v34, %v667_v15  ;;  %v1155_v34 = vld [vmem:[%s1517_s29 + $0x1e8] sm:$0xff] }
 0x15d   : > { %v846_v36 = vmul.f32 %v1155_v34, %v1760_v25 }
 0x15e   : > { %v676_v39 = vrot.slane %v675_v7, 4  ;;  %v827_v40 = vpop.permute.xlu1 %826 }
 0x15f   : > { %v845_v30 = vmul.f32 %v1154_v22, %v827_v40 }
 0x160   : > { %v677_v43 = vadd.f32 %v676_v39, %v675_v7  ;;  %v927_v54 = vpop.permute.xlu2 %926 }
 0x161   : > { %v937_v33 = vmul.f32 %v1165_v28, %v927_v54  ;;  %v853_v38 = vadd.f32 %v852_v24, %v845_v30 }
 0x162   : > { %v678_v44 = vrot.slane %v677_v43, 2 }
 0x163   : > { %v854_v50 = vadd.f32 %v853_v38, %v846_v36 }
 0x164   : > { %v679_v53 = vadd.f32 %v678_v44, %v677_v43 }
 0x166   : > { %v680_v0 = vrot.slane %v679_v53, 1 }
 0x167   : > { %v742_v11 = vpop.permute.xlu1 %741 }
 0x168   : > { %v681_v12 = vadd.f32 %v680_v0, %v679_v53  ;;  %v756_v14 = vmul.f32 %v1146_v58, %v742_v11  ;;  %v793_v0 = vld [vmem:[#allocation2 + $0x6] sm:$0x1] }
 0x169   : > { %v957_v11 = vld [vmem:[%s1836_s0] sm:$0xff] }
 0x16a   : > { %v682_v20 = vadd.f32 %v681_v12, %v613_v10  ;;  %v764_v56 = vadd.f32 %v763_v59, %v756_v14 }
 0x16c   : > { %683 = vst [vmem:[#allocation2 + $0x4] sm:$0x1] %v682_v20  ;;  %v765_v26 = vadd.f32 %v764_v56, %v757_v16 }
 0x16e   : > { %v766_v8 = vrot.slane %v765_v26, 4 }
 0x170   : > { %v767_v31 = vadd.f32 %v766_v8, %v765_v26  ;;  %v922_v4 = vpop.permute.xlu1 %921 }
 0x171   : > { %v936_v32 = vmul.f32 %v1164_v9, %v922_v4 }
 0x172   : > { %v768_v15 = vrot.slane %v767_v31, 2 }
 0x173   : > { %v944_v6 = vadd.f32 %v943_v55, %v936_v32 }
 0x174   : > { %v769_v35 = vadd.f32 %v768_v15, %v767_v31 }
 0x175   : > { %v945_v7 = vadd.f32 %v944_v6, %v937_v33 }
 0x176   : > { %v770_v39 = vrot.slane %v769_v35, 1 }
 0x177   : > { %v946_v57 = vrot.slane %v945_v7, 4 }
 0x178   : > { %v771_v43 = vadd.f32 %v770_v39, %v769_v35 }
 0x179   : > { %v947_v45 = vadd.f32 %v946_v57, %v945_v7  ;;  %v837_v48 = vpop.permute.xlu1 %836 }
 0x17a   : > { %v772_v49 = vadd.f32 %v771_v43, %v703_v41  ;;  %v847_v44 = vmul.f32 %v1156_v42, %v837_v48 }
 0x17b   : > { %v948_v40 = vrot.slane %v947_v45, 2 }
 0x17c   : > { %773 = vst [vmem:[#allocation2 + $0x5] sm:$0x1] %v772_v49  ;;  %v855_v51 = vadd.f32 %v854_v50, %v847_v44 }
 0x17d   : > { %v949_v52 = vadd.f32 %v948_v40, %v947_v45 }
 0x17e   : > { %v856_v46 = vrot.slane %v855_v51, 4 }
 0x17f   : > { %v950_v53 = vrot.slane %v949_v52, 1 }
 0x180   : > { %v857_v58 = vadd.f32 %v856_v46, %v855_v51 }
 0x181   : > { %v951_v25 = vadd.f32 %v950_v53, %v949_v52 }
 0x182   : > { %v858_v60 = vrot.slane %v857_v58, 2 }
 0x183   : > { %v952_v61 = vadd.f32 %v951_v25, %v883_v47 }
 0x184   : > { %v859_v37 = vadd.f32 %v858_v60, %v857_v58 }
 0x185   : > { %953 = vst [vmem:[#allocation2 + $0x7] sm:$0x1] %v952_v61 }
 0x186   : > { %v860_v63 = vrot.slane %v859_v37, 1 }
 0x188   : > { %v861_v3 = vadd.f32 %v860_v63, %v859_v37 }
 0x18a   : > { %v862_v10 = vadd.f32 %v861_v3, %v793_v0 }
 0x18c   : > { %863 = vst [vmem:[#allocation2 + $0x6] sm:$0x1] %v862_v10 }
 0x193   : > { %v958_v12 = vld [vmem:[#allocation2] sm:$0xff] }
 0x194   : > { %978 = vmatpush.msra.mxu0 %v958_v12 }
 0x195   : > { %1166 = vmatmul.msk.f32.vlgmr.msra.gmra.mxu0 %vm959_vm0, %v957_v11 }
 0x212   : > { %v980_v14 = vpop.f32.mrf.mxu0 }
 0x213   : > { %983 = vst [vmem:[%s222_s10] sm:$0xff] %v980_v14 }
 0x214   : > { %1350 = shalt.err (!%p1347_p13)
}
 0x215   : > { %1175 = dma.vmem_to_hbm [thread:$0]  (%p1490_p9), %s998_s11, 128, %s1000_s18, %s985_s19  }
 0x216 PF: > { %s1011_s21 = sand.u32 1, %s1385_s12   ;;  %p1182_p0 = pnand %p1099_p12, %p1497_p11 }
 0x217   : > { %s1012_s5 = scalar_lea.sflag [#allocation5], %s1011_s21 }
 0x218   : > { %p1183_p1 = pneg %p1182_p0 }
 0x21a   : > { %1380 = dma.done.wait (%p1183_p1), %s1012_s5, 128  }
 0x21b   : > { %1382 = vsyncadd (%p1183_p1), %s1012_s5, 4294967168  ;;  %s19_s17 = sadd.s32 1, %s1405_s17   ;;  %s1844_s12 = smov %s1389_s13 }
 0x21c   : > { %p16_p2 = scmp.ge.s32.totalorder %s19_s17, 4   ;;  %s1845_s13 = smov %s1393_s14 }
 0x21d   : > { %s1846_s14 = smov %s1495_s26  ;;  %s1847_s15 = smov %s1401_s16 }
 0x21e   : > { %s1848_s16 = smov %s1850_s20  ;;  %18 = sbr.rel (!%p16_p2) target bundleno = 6 (0x6), region = 95 }
 0x223   :  { %1018 = vsyncpa [#allocation4], 1 }
 0x224   :  { %1020 = vsyncpa [#allocation4 + $0x1], 1 }
 0x225   :  { %1021 = vsyncpa [#allocation5], 1 }
 0x226   :  { %1023 = vsyncpa [#allocation5 + $0x1], 1 }

</bundles_post_ra>
